<compile_context>
chip_gen: v7x
topology: tpu7x:2x2x1
jax: 0.10.0
libtpu: 0.0.40
codegen_flags: <defaults>
</compile_context>

<pallas_src>
import functools

import jax
import jax.numpy as jnp
from jax.experimental import pallas as pl
from jax.experimental.pallas import tpu as pltpu


def _focal_distill_kl_kernel(t_ref, ys_ref, yt_ref, out_ref, *, gamma):
    # t_ref:   SMEM (1,)       learnable temperature T
    # ys_ref:  VMEM (TB, C)    student logits block
    # yt_ref:  VMEM (TB, C)    teacher logits block
    # out_ref: VMEM (TB, 1)    per-row sum_c( focal * KL )   (f32)
    T = t_ref[0]
    inv_T = 1.0 / T

    ys = ys_ref[...].astype(jnp.float32) * inv_T
    yt = yt_ref[...].astype(jnp.float32) * inv_T

    # Shift by per-row max (numerically stable softmax), class axis on lanes.
    ys = ys - jnp.max(ys, axis=-1, keepdims=True)
    yt = yt - jnp.max(yt, axis=-1, keepdims=True)

    # Student: only the (TB,1) log-denominator is needed (log_p_s is fused below).
    log_den_s = jnp.log(jnp.sum(jnp.exp(ys), axis=-1, keepdims=True))

    # Teacher: softmax + its (TB,1) log-denominator.
    yt_exp = jnp.exp(yt)
    yt_sum = jnp.sum(yt_exp, axis=-1, keepdims=True)
    # EUP reciprocal (single vrcp slot); ~2^-12 rel. error is negligible here.
    p_t = yt_exp * pl.reciprocal(yt_sum, approx=True)
    log_den_t = jnp.log(yt_sum)

    # log p_t - log p_s = (yt - log_den_t) - (ys - log_den_s), fused in one tile.
    log_ratio = (yt - ys) + (log_den_s - log_den_t)

    # focal weight (1 - p_t)^gamma  (gamma static; default 2 -> unrolled muls).
    if gamma == 0:
        focal_kl = p_t * log_ratio
    else:
        one_minus_pt = 1.0 - p_t
        if isinstance(gamma, int) and gamma > 0:
            focal = one_minus_pt
            for _ in range(gamma - 1):
                focal = focal * one_minus_pt
        else:
            focal = jnp.power(one_minus_pt, jnp.float32(gamma))
        # F.kl_div(log_p_s, p_t, reduction='none') = p_t * (log p_t - log p_s)
        focal_kl = focal * (p_t * log_ratio)

    # Per-row sum over classes. Padded rows of a partial last block compute on
    # garbage but are row-independent and their output writes are discarded.
    out_ref[...] = jnp.sum(focal_kl, axis=-1, keepdims=True)


# Minimum sublane multiple per itemsize (f32 -> 8, bf16 -> 16, int8/fp8 -> 32).
_SUBLANE_MULT = {4: 8, 2: 16, 1: 32}


def _choose_block_rows(batch, num_classes, itemsize,
                       target_bytes=4 << 20,     # ~4 MiB per input tile
                       vmem_budget=44 << 20,     # v7x-safe working-set budget
                       min_blocks=8):            # >= 4 grid blocks per TC on v7x
    """Pick a dtype-aligned row tile from byte target, VMEM budget, parallelism."""
    mult = _SUBLANE_MULT.get(itemsize, 8)
    if batch <= mult:
        return int(batch)                 # block == full dim -> always layout-legal
    b_padded = -(-batch // mult) * mult

    def align_down(r):
        return max(mult, (int(r) // mult) * mult)

    # ~target_bytes of input bytes per tile.
    rows_target = align_down(target_bytes // max(1, num_classes * itemsize))
    # VMEM cap: 2 inputs x 2 pipeline buffers + ~10 live f32 tile temporaries.
    # TODO(synk): for vocab-scale C (~1e5) this still floors at `mult` rows and
    # may exceed VMEM; class-axis tiling with an online-softmax reduction would
    # be needed there.
    per_row_bytes = 4 * num_classes * itemsize + 10 * num_classes * 4
    rows_vmem = align_down((vmem_budget - (4 << 20)) // max(1, per_row_bytes))
    # Keep >= min_blocks grid steps (megacore sharding + DMA/compute overlap).
    rows_parallel = align_down(pl.cdiv(batch, min_blocks))

    rows = min(rows_target, rows_vmem, rows_parallel, b_padded)
    return int(max(mult, rows))


def focal_distill_kl(y_s, y_t, T, gamma=2, block_rows=None):
    """Pallas implementation of FocalDistillKL.forward. Returns a scalar loss."""
    assert y_s.shape == y_t.shape and y_s.ndim == 2
    B, C = y_s.shape
    itemsize = jnp.dtype(y_s.dtype).itemsize
    if block_rows is None:
        block_rows = _choose_block_rows(B, C, itemsize)
    num_blocks = pl.cdiv(B, block_rows)

    t_arr = jnp.asarray(T, dtype=jnp.float32).reshape((1,))

    # VMEM budget: 2 inputs x 2 pipeline buffers + live f32 intermediates + slack.
    tile_in_bytes = block_rows * C * itemsize
    tile_f32_bytes = block_rows * C * 4
    vmem_limit = 4 * tile_in_bytes + 10 * tile_f32_bytes + (4 << 20)
    # Lower clamp: above the 16/32 MiB scoped defaults. Upper clamp: stays within
    # v7x's 64 MiB physical VMEM (generous but safe on v5e/v6e's 128 MiB too).
    vmem_limit = int(min(max(vmem_limit, 16 << 20), 56 << 20))

    cost = pl.CostEstimate(
        flops=12 * B * C,                        # elementwise VPU work
        transcendentals=2 * B * C + 4 * B,       # 2x exp per element + row logs/rcp
        bytes_accessed=2 * B * C * itemsize + B * 4,
    )

    kernel = functools.partial(_focal_distill_kl_kernel, gamma=gamma)

    per_row = pl.pallas_call(
        kernel,
        out_shape=jax.ShapeDtypeStruct((B, 1), jnp.float32),
        grid=(num_blocks,),
        in_specs=[
            pl.BlockSpec(memory_space=pltpu.MemorySpace.SMEM),      # T scalar
            pl.BlockSpec((block_rows, C), lambda i: (i, 0)),        # y_s block
            pl.BlockSpec((block_rows, C), lambda i: (i, 0)),        # y_t block
        ],
        out_specs=pl.BlockSpec((block_rows, 1), lambda i: (i, 0)),  # per-row sums
        compiler_params=pltpu.CompilerParams(
            dimension_semantics=("parallel",),   # shards blocks across TCs on v7x
            vmem_limit_bytes=vmem_limit,
        ),
        cost_estimate=cost,
    )(t_arr, y_s, y_t)

    t32 = jnp.asarray(T, dtype=jnp.float32)
    return jnp.mean(per_row) * (t32 * t32)


def _reference(y_s, y_t, T, gamma=2):
    ys = y_s.astype(jnp.float32) / T
    yt = y_t.astype(jnp.float32) / T
    log_p_s = jax.nn.log_softmax(ys, axis=1)
    p_t = jax.nn.softmax(yt, axis=1)
    log_p_t = jax.nn.log_softmax(yt, axis=1)
    kl = p_t * (log_p_t - log_p_s)
    loss = jnp.mean(jnp.sum(((1.0 - p_t) ** gamma) * kl, axis=1))
    return loss * T * T


if __name__ == "__main__":
    # Deterministic "parameter" init (module __init__ takes initial_T).
    initial_T = 4.0          # nn.Parameter(torch.tensor(initial_T))
    gamma = 2                # default in the module
    # TODO(synk): self.temperature = 0.07 is unused in forward(); not translated.

    key = jax.random.PRNGKey(0)
    k1, k2, k3, k4, k5, k6 = jax.random.split(key, 6)

    # Tolerance note: pl.reciprocal(approx=True) introduces ~2^-12 relative error
    # in p_t, so compare at 1e-3 rather than float-exact tolerances.
    TOL = dict(atol=1e-3, rtol=1e-3)

    # 1) Small [batch, num_classes] logits (single-block path, full-dim block).
    B, C = 8, 32
    y_s = jax.random.normal(k1, (B, C), dtype=jnp.float32)
    y_t = jax.random.normal(k2, (B, C), dtype=jnp.float32)
    loss = jax.block_until_ready(focal_distill_kl(y_s, y_t, initial_T, gamma=gamma))
    ref = _reference(y_s, y_t, initial_T, gamma=gamma)
    assert jnp.allclose(loss, ref, **TOL), (loss, ref)

    # 2) Multi-block grid with a partial (padded) last block.
    B2, C2 = 20, 128
    y_s2 = jax.random.normal(k3, (B2, C2), dtype=jnp.float32)
    y_t2 = jax.random.normal(k4, (B2, C2), dtype=jnp.float32)
    loss2 = jax.block_until_ready(
        focal_distill_kl(y_s2, y_t2, initial_T, gamma=gamma, block_rows=8))
    ref2 = _reference(y_s2, y_t2, initial_T, gamma=gamma)
    assert jnp.allclose(loss2, ref2, **TOL), (loss2, ref2)

    # 3) bf16 logits: exercises dtype-aware (16-row) sublane alignment; math in f32.
    B3, C3 = 32, 128
    y_s3 = jax.random.normal(k5, (B3, C3), dtype=jnp.float32).astype(jnp.bfloat16)
    y_t3 = jax.random.normal(k6, (B3, C3), dtype=jnp.float32).astype(jnp.bfloat16)
    loss3 = jax.block_until_ready(focal_distill_kl(y_s3, y_t3, initial_T, gamma=gamma))
    ref3 = _reference(y_s3, y_t3, initial_T, gamma=gamma)
    assert jnp.allclose(loss3, ref3, atol=2e-3, rtol=2e-3), (loss3, ref3)

    print("KERNEL_OK")
</pallas_src>

<mosaic_0001>
module attributes {stable_mosaic.version = 11 : i64} {
  func.func @_focal_distill_kl_kernel(%arg0: i32, %arg1: memref<1xf32, #tpu.memory_space<smem>>, %arg2: memref<8x32xf32, #tpu.memory_space<vmem>>, %arg3: memref<8x32xf32, #tpu.memory_space<vmem>>, %arg4: memref<8x1xf32, #tpu.memory_space<vmem>>) attributes {dimension_semantics = [#tpu.dimension_semantics<parallel>], iteration_bounds = array<i64: 1>, scalar_prefetch = 0 : i64, scratch_operands = 0 : i64, tpu.core_type = #tpu.core_type<tc>, window_params = [{transform_indices = @transform_0, window_bounds = array<i64: 1>}, {transform_indices = @transform_1, window_bounds = array<i64: 8, 32>}, {transform_indices = @transform_2, window_bounds = array<i64: 8, 32>}, {transform_indices = @transform_3, window_bounds = array<i64: 8, 1>}]} {
    %c0 = arith.constant 0 : index
    %0 = memref.load %arg1[%c0] : memref<1xf32, #tpu.memory_space<smem>>
    %cst = arith.constant 1.000000e+00 : f32
    %1 = arith.divf %cst, %0 : f32
    %c0_0 = arith.constant 0 : index
    %c0_1 = arith.constant 0 : index
    %2 = vector.load %arg2[%c0_0, %c0_1] : memref<8x32xf32, #tpu.memory_space<vmem>>, vector<8x32xf32>
    %3 = vector.broadcast %1 : f32 to vector<8x32xf32>
    %4 = arith.mulf %2, %3 : vector<8x32xf32>
    %c0_2 = arith.constant 0 : index
    %c0_3 = arith.constant 0 : index
    %5 = vector.load %arg3[%c0_2, %c0_3] : memref<8x32xf32, #tpu.memory_space<vmem>>, vector<8x32xf32>
    %6 = vector.broadcast %1 : f32 to vector<8x32xf32>
    %7 = arith.mulf %5, %6 : vector<8x32xf32>
    %cst_4 = arith.constant dense<0xFF800000> : vector<8xf32>
    %8 = vector.multi_reduction <maximumf>, %4, %cst_4 [1] : vector<8x32xf32> to vector<8xf32>
    %9 = vector.shape_cast %8 : vector<8xf32> to vector<8x1xf32>
    %10 = vector.broadcast %9 : vector<8x1xf32> to vector<8x32xf32>
    %11 = arith.subf %4, %10 : vector<8x32xf32>
    %cst_5 = arith.constant dense<0xFF800000> : vector<8xf32>
    %12 = vector.multi_reduction <maximumf>, %7, %cst_5 [1] : vector<8x32xf32> to vector<8xf32>
    %13 = vector.shape_cast %12 : vector<8xf32> to vector<8x1xf32>
    %14 = vector.broadcast %13 : vector<8x1xf32> to vector<8x32xf32>
    %15 = arith.subf %7, %14 : vector<8x32xf32>
    %16 = math.exp %11 : vector<8x32xf32>
    %cst_6 = arith.constant dense<0.000000e+00> : vector<8xf32>
    %17 = vector.multi_reduction <add>, %16, %cst_6 [1] : vector<8x32xf32> to vector<8xf32>
    %18 = vector.shape_cast %17 : vector<8xf32> to vector<8x1xf32>
    %19 = math.log %18 : vector<8x1xf32>
    %20 = math.exp %15 : vector<8x32xf32>
    %cst_7 = arith.constant dense<0.000000e+00> : vector<8xf32>
    %21 = vector.multi_reduction <add>, %20, %cst_7 [1] : vector<8x32xf32> to vector<8xf32>
    %22 = vector.shape_cast %21 : vector<8xf32> to vector<8x1xf32>
    %23 = tpu.reciprocal %22 {approx = true} : vector<8x1xf32> -> vector<8x1xf32>
    %24 = vector.broadcast %23 : vector<8x1xf32> to vector<8x32xf32>
    %25 = arith.mulf %20, %24 : vector<8x32xf32>
    %26 = math.log %22 : vector<8x1xf32>
    %27 = arith.subf %15, %11 : vector<8x32xf32>
    %28 = arith.subf %19, %26 : vector<8x1xf32>
    %29 = vector.broadcast %28 : vector<8x1xf32> to vector<8x32xf32>
    %30 = arith.addf %27, %29 : vector<8x32xf32>
    %cst_8 = arith.constant 1.000000e+00 : f32
    %31 = vector.broadcast %cst_8 : f32 to vector<8x32xf32>
    %32 = arith.subf %31, %25 : vector<8x32xf32>
    %33 = arith.mulf %32, %32 : vector<8x32xf32>
    %34 = arith.mulf %25, %30 : vector<8x32xf32>
    %35 = arith.mulf %33, %34 : vector<8x32xf32>
    %cst_9 = arith.constant dense<0.000000e+00> : vector<8xf32>
    %36 = vector.multi_reduction <add>, %35, %cst_9 [1] : vector<8x32xf32> to vector<8xf32>
    %37 = vector.shape_cast %36 : vector<8xf32> to vector<8x1xf32>
    %c0_10 = arith.constant 0 : index
    %c0_11 = arith.constant 0 : index
    %38 = vector.load %arg4[%c0_10, %c0_11] : memref<8x1xf32, #tpu.memory_space<vmem>>, vector<8x1xf32>
    tpu.vector_store %arg4[%c0_10, %c0_11], %37 {strides = array<i32>} : memref<8x1xf32, #tpu.memory_space<vmem>>, vector<8x1xf32>,
    return
  }
  func.func @transform_0(%arg0: i32) -> i32 {
    %c0_i32 = arith.constant 0 : i32
    %c0_i32_0 = arith.constant 0 : i32
    return %c0_i32 : i32
  }
  func.func @transform_1(%arg0: i32) -> (i32, i32) {
    %c0_i32 = arith.constant 0 : i32
    %c0_i32_0 = arith.constant 0 : i32
    return %arg0, %c0_i32 : i32, i32
  }
  func.func @transform_2(%arg0: i32) -> (i32, i32) {
    %c0_i32 = arith.constant 0 : i32
    %c0_i32_0 = arith.constant 0 : i32
    return %arg0, %c0_i32 : i32, i32
  }
  func.func @transform_3(%arg0: i32) -> (i32, i32) {
    %c0_i32 = arith.constant 0 : i32
    %c0_i32_0 = arith.constant 0 : i32
    return %arg0, %c0_i32 : i32, i32
  }
}

</mosaic_0001>

<bundles_post_ra>
// kernel: tpu_custom_call.1
= control target key start
LH: loop header
LB: loop body
LE: loop exit
PB: predicated region body
PF: predicated region fallthrough
CT: control target
= control target key end

     0   :  { %9 = vsyncpa [#allocation4], 0  ;;  %s212_s0 = inlined_call_operand.<no memory space> [shape: f32[1], index: 0, kind: input, shape index: {}]   ;;  %s213_s1 = inlined_call_operand.hbm [shape: f32[8,32], index: 1, kind: input, shape index: {}]   ;;  %s214_s2 = inlined_call_operand.hbm [shape: f32[8,32], index: 2, kind: input, shape index: {}]   ;;  %s215_s3 = inlined_call_operand.vmem [shape: f32[8,1], index: 3, kind: output, shape index: {}]  }
   0x1   :  { %10 = vsyncpa [#allocation6], 0  ;;  %s155_s12 = smov [#allocation3]   ;;  %s156_s14 = smov [#allocation5]  }
   0x2   :  { %s19_s13 = sshll.u32 %s155_s12, 4  ;;  %s29_s15 = sshll.u32 %s156_s14, 4  ;;  %s20_s13 = int_to_ptr.vmem [resolvable:$true] %s19_s13  ;;  %s30_s15 = int_to_ptr.vmem [resolvable:$true] %s29_s15 }
   0x3   :  { %s107_s18 = scalar_lea.hbm %s213_s1, 128 }
   0x4   :  { %p108_p0 = scmp.ne.s32.totalorder %s213_s1, %s107_s18  ;;  %p111_p1 = scmp.lt.u32.totalorder %s107_s18, %s213_s1 }
   0x6   :  { %p113_p2 = pnand %p111_p1, %p108_p0 }
   0x8   :  { %116 = shalt.err (!%p113_p2)
}
   0x9   :  { %s117_s23 = scalar_lea.vmem %s20_s13, 128  ;;  %p122_p4 = scmp.lt.s32.totalorder %s20_s13, %s20_s13 }
   0xa   :  { %p118_p3 = scmp.ne.s32.totalorder %s20_s13, %s117_s23  ;;  %p123_p5 = scmp.lt.s32.totalorder %s117_s23, %s117_s23 }
   0xc   :  { %p124_p6 = por %p123_p5, %p122_p4 }
   0xe   :  { %p125_p7 = pnand %p124_p6, %p118_p3 }
  0x10   :  { %128 = shalt.err (!%p125_p7)
}
  0x11   :  { %22 = dma.hbm_to_vmem [thread:$0]  %s213_s1, 128, %s20_s13, [#allocation4]  }
  0x12   :  { %s129_s28 = scalar_lea.hbm %s214_s2, 128 }
  0x13   :  { %p130_p8 = scmp.ne.s32.totalorder %s214_s2, %s129_s28  ;;  %p133_p9 = scmp.lt.u32.totalorder %s129_s28, %s214_s2 }
  0x15   :  { %p135_p10 = pnand %p133_p9, %p130_p8 }
  0x17   :  { %138 = shalt.err (!%p135_p10)
}
  0x18   :  { %s139_s6 = scalar_lea.vmem %s30_s15, 128  ;;  %p144_p12 = scmp.lt.s32.totalorder %s30_s15, %s30_s15 }
  0x19   :  { %p140_p11 = scmp.ne.s32.totalorder %s30_s15, %s139_s6  ;;  %p145_p13 = scmp.lt.s32.totalorder %s139_s6, %s139_s6 }
  0x1b   :  { %p146_p0 = por %p145_p13, %p144_p12 }
  0x1d   :  { %p147_p1 = pnand %p146_p0, %p140_p11 }
  0x1f   :  { %150 = shalt.err (!%p147_p1)
}
  0x20   :  { %32 = dma.hbm_to_vmem [thread:$0]  %s214_s2, 128, %s30_s15, [#allocation6]  }
  0x21   :  { %151 = dma.done.wait [#allocation4], 128  }
  0x22   :  { %152 = vsyncadd [#allocation4], 4294967168  ;;  %v40_v0 = vstv %s212_s0 }
  0x23   :  { %153 = dma.done.wait [#allocation6], 128  }
  0x24   :  { %154 = vsyncadd [#allocation6], 4294967168  ;;  %95 = vrcp.f32 %v40_v0  ;;  %v43_v2 = vld [vmem:[#allocation3] sm:$0xff]  ;;  %v46_v4 = vld [vmem:[#allocation5] sm:$0xff]  ;;  %vm48_vm0 = vcmask 261120   ;;  %vm83_vm1 = vcmask 7168  }
  0x2e   :  { %v96_v1 = vpop.eup %95 }
  0x2f   :  { %91 = vpush %v96_v1 }
  0x60   :  { %s92_s10 = spop %91 }
  0x61   :  { %v44_v3 = vstv %s92_s10 }
  0x62   :  { %v45_v5 = vmul.f32 %v44_v3, %v43_v2  ;;  %v47_v6 = vmul.f32 %v46_v4, %v44_v3 }
  0x64   :  { %v49_v7 = vsel %vm48_vm0, %v45_v5, -inf  ;;  %v53_v8 = vsel %vm48_vm0, %v47_v6, -inf }
  0x65   :  { %50 = vmax.xlane.f32.xlu0 %v49_v7 }
  0x69   :  { %54 = vmax.xlane.f32.xlu0 %v53_v8 }
  0xf2   :  { %v51_v9 = vpop.xlane.xlu0 %50 }
  0xf3   :  { %v52_v10 = vsub.f32 %v45_v5, %v51_v9 }
  0xf5   :  { %v57_v11 = vmul.f32 1.442695, %v52_v10 }
  0xf6   :  { %v55_v12 = vpop.xlane.xlu0 %54 }
  0xf7   :  { %97 = vpow2.f32 %v57_v11  ;;  %v56_v13 = vsub.f32 %v47_v6, %v55_v12 }
  0xf9   :  { %v64_v14 = vmul.f32 1.442695, %v56_v13  ;;  %v73_v15 = vsub.f32 %v56_v13, %v52_v10 }
  0xfb   :  { %99 = vpow2.f32 %v64_v14 }
 0x101   :  { %v98_v16 = vpop.eup %97 }
 0x102   :  { %v59_v17 = vsel %vm48_vm0, %v98_v16, 0.0 }
 0x103   :  { %60 = vadd.xlane.f32.xlu1 %v59_v17 }
 0x105   :  { %v100_v18 = vpop.eup %99 }
 0x106   :  { %v66_v19 = vsel %vm48_vm0, %v100_v18, 0.0 }
 0x107   :  { %67 = vadd.xlane.f32.xlu1 %v66_v19 }
 0x190   :  { %v61_v20 = vpop.xlane.xlu1 %60 }
 0x191   :  { %101 = vlog2.f32 %v61_v20 }
 0x194   :  { %v68_v21 = vpop.xlane.xlu1 %67 }
 0x195   :  { %103 = vrcp.f32 %v68_v21 }
 0x196   :  { %105 = vlog2.f32 %v68_v21 }
 0x19b   :  { %v102_v22 = vpop.eup %101 }
 0x19c   :  { %v63_v26 = vmul.f32 0.6931472, %v102_v22 }
 0x19f   :  { %v104_v23 = vpop.eup %103 }
 0x1a0   :  { %v106_v24 = vpop.eup %105  ;;  %v70_v25 = vmul.f32 %v104_v23, %v100_v18 }
 0x1a1   :  { %v72_v27 = vmul.f32 0.6931472, %v106_v24 }
 0x1a2   :  { %v76_v29 = vsub.f32 1.0, %v70_v25 }
 0x1a3   :  { %v74_v28 = vsub.f32 %v63_v26, %v72_v27 }
 0x1a4   :  { %v77_v31 = vmul.f32 %v76_v29, %v76_v29 }
 0x1a5   :  { %v75_v30 = vadd.f32 %v74_v28, %v73_v15 }
 0x1a7   :  { %v78_v32 = vmul.f32 %v75_v30, %v70_v25 }
 0x1a9   :  { %v79_v33 = vmul.f32 %v78_v32, %v77_v31 }
 0x1ab   :  { %v80_v34 = vsel %vm48_vm0, %v79_v33, 0.0 }
 0x1ac   :  { %81 = vadd.xlane.f32.xlu0 %v80_v34 }
 0x239   :  { %v82_v35 = vpop.xlane.xlu0 %81 }
 0x23a   :  { %84 = vst.msk [vmem:[%s215_s3] sm:$0xff] %vm83_vm1, %v82_v35 }
 0x23b   :  { %89 = vsyncpa [#allocation4], 1 }
 0x23c   :  { %90 = vsyncpa [#allocation6], 1 }

</bundles_post_ra>
